<compile_context>
chip_gen: v7x
topology: tpu7x:2x2x1
jax: 0.10.0
libtpu: 0.0.40
codegen_flags: <defaults>
</compile_context>

<pallas_src>
import functools

import jax
import jax.numpy as jnp
from jax.experimental import pallas as pl
from jax.experimental.pallas import tpu as pltpu


def _round_up(x, m):
    return ((x + m - 1) // m) * m


def _autoencoder_kernel(x_ref, w0_ref, wp_ref, bp_ref, out_ref, *, n_layers):
    # x_ref : (TB, D)        f32   activation batch tile (D = true flattened input width)
    # w0_ref: (D, P)         bf16  layer-0 weight (true input width in, lane-padded out)
    # wp_ref: (L-1, P, P)    bf16  packed, zero-padded weights for layers 1..L-1
    # bp_ref: (L, 1, P)      f32   packed, zero-padded biases
    # out_ref:(TB, P)        f32   lane-dense padded output slab
    x = x_ref[...].astype(jnp.bfloat16)
    biases = bp_ref[...]                      # (L, 1, P), loaded once

    # layer 0: Linear(K=D, N=P) + ReLU
    h = jnp.dot(x, w0_ref[...], preferred_element_type=jnp.float32) + biases[0]
    h = jnp.maximum(h, 0.0)

    # layers 1 .. L-1: P x P padded matmuls; ReLU on all but the final layer
    for l in range(1, n_layers):
        h = jnp.dot(h.astype(jnp.bfloat16), wp_ref[l - 1],
                    preferred_element_type=jnp.float32) + biases[l]
        if l != n_layers - 1:
            h = jnp.maximum(h, 0.0)

    out_ref[...] = h.astype(out_ref.dtype)


def init_autoencoder_params(key, input_size, hidden_dims=(64, 32, 16)):
    """Deterministic init mimicking nn.Linear default U[-1/sqrt(in), 1/sqrt(in)].

    Weights are stored as (in_features, out_features); layer order matches the
    PyTorch module: encoder (input->64->32->16), decoder (16->32->64->input)."""
    dims = []
    curr = input_size
    for hd in hidden_dims:            # encoder
        dims.append((curr, hd))
        curr = hd
    rev = list(hidden_dims)[::-1]
    for hd in rev[1:]:                # decoder hidden layers
        dims.append((curr, hd))
        curr = hd
    dims.append((curr, input_size))   # decoder output layer

    params = []
    for (din, dout) in dims:
        key, kw, kb = jax.random.split(key, 3)
        bound = 1.0 / jnp.sqrt(jnp.float32(din))
        w = jax.random.uniform(kw, (din, dout), jnp.float32, -bound, bound)
        b = jax.random.uniform(kb, (1, dout), jnp.float32, -bound, bound)
        params.append((w, b))
    return params


@functools.partial(jax.jit, static_argnums=(2,))
def autoencoder_forward(x, params, batch_tile=256):
    """x: any shape (B, ...); flattened to (B, input_size) like x.view(B, -1)."""
    B = x.shape[0]
    x2 = x.reshape(B, -1).astype(jnp.float32)
    D = x2.shape[1]
    L = len(params)

    # lane-dense padded feature width (covers every hidden dim and the output dim)
    out_dims = [w.shape[1] for (w, _) in params]
    P = _round_up(max(out_dims), 128)

    # ---- pack & pad parameters (exact: padded rows/cols are zero) ----
    w0, b0 = params[0]
    w0p = jnp.zeros((D, P), jnp.bfloat16).at[:, :w0.shape[1]].set(w0.astype(jnp.bfloat16))
    wpack = jnp.zeros((L - 1, P, P), jnp.bfloat16)
    bpack = jnp.zeros((L, 1, P), jnp.float32)
    bpack = bpack.at[0, :, :b0.shape[1]].set(b0)
    for l in range(1, L):
        w, b = params[l]
        wpack = wpack.at[l - 1, :w.shape[0], :w.shape[1]].set(w.astype(jnp.bfloat16))
        bpack = bpack.at[l, :, :b.shape[1]].set(b)

    # ---- batch tiling: adaptive so tiny batches only pad to 8 rows ----
    TB = min(batch_tile, _round_up(B, 8))
    Bp = _round_up(B, TB)
    if Bp != B:
        # TODO(synk): for very large ragged B, mask the tail tile in-kernel instead of
        # materializing a zero-padded copy of x here (padding is exact for correctness).
        x2 = jnp.pad(x2, ((0, Bp - B), (0, 0)))

    grid = (Bp // TB,)

    # advisory scheduling hints
    flops = 2 * Bp * (D * P + (L - 1) * P * P)
    bytes_accessed = (Bp * D * 4 + Bp * P * 4
                      + w0p.size * 2 + wpack.size * 2 + bpack.size * 4)
    cost = pl.CostEstimate(flops=flops, transcendentals=0,
                           bytes_accessed=bytes_accessed)

    # double-buffered activation tiles + resident packed params, with headroom
    param_bytes = w0p.size * 2 + wpack.size * 2 + bpack.size * 4
    tile_bytes = TB * D * 4 + TB * P * 4
    vmem_limit = int(min(max(4 * (2 * tile_bytes + param_bytes), 8 * 1024 * 1024),
                         48 * 1024 * 1024))

    kernel = functools.partial(_autoencoder_kernel, n_layers=L)
    out = pl.pallas_call(
        kernel,
        out_shape=jax.ShapeDtypeStruct((Bp, P), jnp.float32),
        grid=grid,
        in_specs=[
            pl.BlockSpec((TB, D), lambda i: (i, 0)),           # activations: batch-tiled
            pl.BlockSpec((D, P), lambda i: (0, 0)),            # layer-0 weight (resident)
            pl.BlockSpec((L - 1, P, P), lambda i: (0, 0, 0)),  # packed weights (resident)
            pl.BlockSpec((L, 1, P), lambda i: (0, 0, 0)),      # packed biases  (resident)
        ],
        out_specs=pl.BlockSpec((TB, P), lambda i: (i, 0)),     # lane-dense output slab
        compiler_params=pltpu.CompilerParams(
            dimension_semantics=("parallel",),
            vmem_limit_bytes=vmem_limit),
        cost_estimate=cost,
    )(x2, w0p, wpack, bpack)

    return out[:B, :D]


def _reference_forward(x, params, operand_dtype=jnp.float32):
    B = x.shape[0]
    h = x.reshape(B, -1).astype(jnp.float32)
    n = len(params)
    for i, (w, b) in enumerate(params):
        h = jnp.dot(h.astype(operand_dtype), w.astype(operand_dtype),
                    preferred_element_type=jnp.float32) + b
        if i != n - 1:
            h = jnp.maximum(h, 0.0)
    return h


if __name__ == "__main__":
    key = jax.random.PRNGKey(0)
    k_x, k_p = jax.random.split(key)

    # input (2, 4, 8) -> flattened to (2, 32); input_size = 32
    x = jax.random.normal(k_x, (2, 4, 8), jnp.float32)
    input_size = 4 * 8
    params = init_autoencoder_params(k_p, input_size, hidden_dims=(64, 32, 16))

    out = autoencoder_forward(x, params)
    out = jax.block_until_ready(out)

    assert out.shape == (2, input_size), out.shape

    # bf16-operand reference matches the kernel's numerics closely;
    # f32 reference bounds the bf16 quantization error.
    ref_bf16 = _reference_forward(x, params, jnp.bfloat16)
    ref_f32 = _reference_forward(x, params, jnp.float32)
    assert jnp.allclose(out, ref_bf16, atol=1e-2, rtol=1e-2), \
        float(jnp.max(jnp.abs(out - ref_bf16)))
    assert jnp.allclose(out, ref_f32, atol=5e-2, rtol=5e-2), \
        float(jnp.max(jnp.abs(out - ref_f32)))

    print("KERNEL_OK")
</pallas_src>

<mosaic_0001>
module attributes {stable_mosaic.version = 11 : i64} {
  func.func @_autoencoder_kernel(%arg0: i32, %arg1: memref<8x32xf32, #tpu.memory_space<vmem>>, %arg2: memref<32x128xbf16, #tpu.memory_space<vmem>>, %arg3: memref<5x128x128xbf16, #tpu.memory_space<vmem>>, %arg4: memref<6x1x128xf32, #tpu.memory_space<vmem>>, %arg5: memref<8x128xf32, #tpu.memory_space<vmem>>) attributes {dimension_semantics = [#tpu.dimension_semantics<parallel>], iteration_bounds = array<i64: 1>, scalar_prefetch = 0 : i64, scratch_operands = 0 : i64, tpu.core_type = #tpu.core_type<tc>, window_params = [{transform_indices = @transform_0, window_bounds = array<i64: 8, 32>}, {pipeline_mode = #tpu.pipeline_mode<synchronous>, transform_indices = @transform_1, window_bounds = array<i64: 32, 128>}, {pipeline_mode = #tpu.pipeline_mode<synchronous>, transform_indices = @transform_2, window_bounds = array<i64: 5, 128, 128>}, {pipeline_mode = #tpu.pipeline_mode<synchronous>, transform_indices = @transform_3, window_bounds = array<i64: 6, 1, 128>}, {transform_indices = @transform_4, window_bounds = array<i64: 8, 128>}]} {
    %c0 = arith.constant 0 : index
    %c0_0 = arith.constant 0 : index
    %0 = vector.load %arg1[%c0, %c0_0] : memref<8x32xf32, #tpu.memory_space<vmem>>, vector<8x32xf32>
    %1 = arith.truncf %0 : vector<8x32xf32> to vector<8x32xbf16>
    %c0_1 = arith.constant 0 : index
    %c0_2 = arith.constant 0 : index
    %c0_3 = arith.constant 0 : index
    %2 = vector.load %arg4[%c0_1, %c0_2, %c0_3] : memref<6x1x128xf32, #tpu.memory_space<vmem>>, vector<6x1x128xf32>
    %c0_4 = arith.constant 0 : index
    %c0_5 = arith.constant 0 : index
    %3 = vector.load %arg2[%c0_4, %c0_5] : memref<32x128xbf16, #tpu.memory_space<vmem>>, vector<32x128xbf16>
    %cst = arith.constant dense<0.000000e+00> : vector<8x128xf32>
    %4 = tpu.matmul %1, %3, %cst {dimension_numbers = #tpu.dot_dimension_numbers<[1], [0], [0], [1], [0, 0, 1, 1], [], []>} : vector<8x32xbf16>, vector<32x128xbf16>, vector<8x128xf32> -> vector<8x128xf32>
    %5 = vector.extract_strided_slice %2 {offsets = [0, 0, 0], sizes = [1, 1, 128], strides = [1, 1, 1]} : vector<6x1x128xf32> to vector<1x1x128xf32>
    %6 = vector.shape_cast %5 : vector<1x1x128xf32> to vector<1x128xf32>
    %7 = vector.broadcast %6 : vector<1x128xf32> to vector<8x128xf32>
    %8 = arith.addf %4, %7 : vector<8x128xf32>
    %cst_6 = arith.constant 0.000000e+00 : f32
    %9 = vector.broadcast %cst_6 : f32 to vector<8x128xf32>
    %10 = arith.maximumf %8, %9 : vector<8x128xf32>
    %11 = arith.truncf %10 : vector<8x128xf32> to vector<8x128xbf16>
    %c0_7 = arith.constant 0 : index
    %c0_8 = arith.constant 0 : index
    %c0_9 = arith.constant 0 : index
    %12 = vector.load %arg3[%c0_7, %c0_8, %c0_9] : memref<5x128x128xbf16, #tpu.memory_space<vmem>>, vector<1x128x128xbf16>
    %13 = vector.shape_cast %12 : vector<1x128x128xbf16> to vector<128x128xbf16>
    %cst_10 = arith.constant dense<0.000000e+00> : vector<8x128xf32>
    %14 = tpu.matmul %11, %13, %cst_10 {dimension_numbers = #tpu.dot_dimension_numbers<[1], [0], [0], [1], [0, 0, 1, 1], [], []>} : vector<8x128xbf16>, vector<128x128xbf16>, vector<8x128xf32> -> vector<8x128xf32>
    %15 = vector.extract_strided_slice %2 {offsets = [1, 0, 0], sizes = [1, 1, 128], strides = [1, 1, 1]} : vector<6x1x128xf32> to vector<1x1x128xf32>
    %16 = vector.shape_cast %15 : vector<1x1x128xf32> to vector<1x128xf32>
    %17 = vector.broadcast %16 : vector<1x128xf32> to vector<8x128xf32>
    %18 = arith.addf %14, %17 : vector<8x128xf32>
    %cst_11 = arith.constant 0.000000e+00 : f32
    %19 = vector.broadcast %cst_11 : f32 to vector<8x128xf32>
    %20 = arith.maximumf %18, %19 : vector<8x128xf32>
    %21 = arith.truncf %20 : vector<8x128xf32> to vector<8x128xbf16>
    %c1 = arith.constant 1 : index
    %c0_12 = arith.constant 0 : index
    %c0_13 = arith.constant 0 : index
    %22 = vector.load %arg3[%c1, %c0_12, %c0_13] : memref<5x128x128xbf16, #tpu.memory_space<vmem>>, vector<1x128x128xbf16>
    %23 = vector.shape_cast %22 : vector<1x128x128xbf16> to vector<128x128xbf16>
    %cst_14 = arith.constant dense<0.000000e+00> : vector<8x128xf32>
    %24 = tpu.matmul %21, %23, %cst_14 {dimension_numbers = #tpu.dot_dimension_numbers<[1], [0], [0], [1], [0, 0, 1, 1], [], []>} : vector<8x128xbf16>, vector<128x128xbf16>, vector<8x128xf32> -> vector<8x128xf32>
    %25 = vector.extract_strided_slice %2 {offsets = [2, 0, 0], sizes = [1, 1, 128], strides = [1, 1, 1]} : vector<6x1x128xf32> to vector<1x1x128xf32>
    %26 = vector.shape_cast %25 : vector<1x1x128xf32> to vector<1x128xf32>
    %27 = vector.broadcast %26 : vector<1x128xf32> to vector<8x128xf32>
    %28 = arith.addf %24, %27 : vector<8x128xf32>
    %cst_15 = arith.constant 0.000000e+00 : f32
    %29 = vector.broadcast %cst_15 : f32 to vector<8x128xf32>
    %30 = arith.maximumf %28, %29 : vector<8x128xf32>
    %31 = arith.truncf %30 : vector<8x128xf32> to vector<8x128xbf16>
    %c2 = arith.constant 2 : index
    %c0_16 = arith.constant 0 : index
    %c0_17 = arith.constant 0 : index
    %32 = vector.load %arg3[%c2, %c0_16, %c0_17] : memref<5x128x128xbf16, #tpu.memory_space<vmem>>, vector<1x128x128xbf16>
    %33 = vector.shape_cast %32 : vector<1x128x128xbf16> to vector<128x128xbf16>
    %cst_18 = arith.constant dense<0.000000e+00> : vector<8x128xf32>
    %34 = tpu.matmul %31, %33, %cst_18 {dimension_numbers = #tpu.dot_dimension_numbers<[1], [0], [0], [1], [0, 0, 1, 1], [], []>} : vector<8x128xbf16>, vector<128x128xbf16>, vector<8x128xf32> -> vector<8x128xf32>
    %35 = vector.extract_strided_slice %2 {offsets = [3, 0, 0], sizes = [1, 1, 128], strides = [1, 1, 1]} : vector<6x1x128xf32> to vector<1x1x128xf32>
    %36 = vector.shape_cast %35 : vector<1x1x128xf32> to vector<1x128xf32>
    %37 = vector.broadcast %36 : vector<1x128xf32> to vector<8x128xf32>
    %38 = arith.addf %34, %37 : vector<8x128xf32>
    %cst_19 = arith.constant 0.000000e+00 : f32
    %39 = vector.broadcast %cst_19 : f32 to vector<8x128xf32>
    %40 = arith.maximumf %38, %39 : vector<8x128xf32>
    %41 = arith.truncf %40 : vector<8x128xf32> to vector<8x128xbf16>
    %c3 = arith.constant 3 : index
    %c0_20 = arith.constant 0 : index
    %c0_21 = arith.constant 0 : index
    %42 = vector.load %arg3[%c3, %c0_20, %c0_21] : memref<5x128x128xbf16, #tpu.memory_space<vmem>>, vector<1x128x128xbf16>
    %43 = vector.shape_cast %42 : vector<1x128x128xbf16> to vector<128x128xbf16>
    %cst_22 = arith.constant dense<0.000000e+00> : vector<8x128xf32>
    %44 = tpu.matmul %41, %43, %cst_22 {dimension_numbers = #tpu.dot_dimension_numbers<[1], [0], [0], [1], [0, 0, 1, 1], [], []>} : vector<8x128xbf16>, vector<128x128xbf16>, vector<8x128xf32> -> vector<8x128xf32>
    %45 = vector.extract_strided_slice %2 {offsets = [4, 0, 0], sizes = [1, 1, 128], strides = [1, 1, 1]} : vector<6x1x128xf32> to vector<1x1x128xf32>
    %46 = vector.shape_cast %45 : vector<1x1x128xf32> to vector<1x128xf32>
    %47 = vector.broadcast %46 : vector<1x128xf32> to vector<8x128xf32>
    %48 = arith.addf %44, %47 : vector<8x128xf32>
    %cst_23 = arith.constant 0.000000e+00 : f32
    %49 = vector.broadcast %cst_23 : f32 to vector<8x128xf32>
    %50 = arith.maximumf %48, %49 : vector<8x128xf32>
    %51 = arith.truncf %50 : vector<8x128xf32> to vector<8x128xbf16>
    %c4 = arith.constant 4 : index
    %c0_24 = arith.constant 0 : index
    %c0_25 = arith.constant 0 : index
    %52 = vector.load %arg3[%c4, %c0_24, %c0_25] : memref<5x128x128xbf16, #tpu.memory_space<vmem>>, vector<1x128x128xbf16>
    %53 = vector.shape_cast %52 : vector<1x128x128xbf16> to vector<128x128xbf16>
    %cst_26 = arith.constant dense<0.000000e+00> : vector<8x128xf32>
    %54 = tpu.matmul %51, %53, %cst_26 {dimension_numbers = #tpu.dot_dimension_numbers<[1], [0], [0], [1], [0, 0, 1, 1], [], []>} : vector<8x128xbf16>, vector<128x128xbf16>, vector<8x128xf32> -> vector<8x128xf32>
    %55 = vector.extract_strided_slice %2 {offsets = [5, 0, 0], sizes = [1, 1, 128], strides = [1, 1, 1]} : vector<6x1x128xf32> to vector<1x1x128xf32>
    %56 = vector.shape_cast %55 : vector<1x1x128xf32> to vector<1x128xf32>
    %57 = vector.broadcast %56 : vector<1x128xf32> to vector<8x128xf32>
    %58 = arith.addf %54, %57 : vector<8x128xf32>
    %c0_27 = arith.constant 0 : index
    %c0_28 = arith.constant 0 : index
    %59 = vector.load %arg5[%c0_27, %c0_28] : memref<8x128xf32, #tpu.memory_space<vmem>>, vector<8x128xf32>
    tpu.vector_store %arg5[%c0_27, %c0_28], %58 {strides = array<i32>} : memref<8x128xf32, #tpu.memory_space<vmem>>, vector<8x128xf32>,
    return
  }
  func.func @transform_0(%arg0: i32) -> (i32, i32) {
    %c0_i32 = arith.constant 0 : i32
    %c0_i32_0 = arith.constant 0 : i32
    return %arg0, %c0_i32 : i32, i32
  }
  func.func @transform_1(%arg0: i32) -> (i32, i32) {
    %c0_i32 = arith.constant 0 : i32
    %c0_i32_0 = arith.constant 0 : i32
    %c0_i32_1 = arith.constant 0 : i32
    return %c0_i32, %c0_i32_0 : i32, i32
  }
  func.func @transform_2(%arg0: i32) -> (i32, i32, i32) {
    %c0_i32 = arith.constant 0 : i32
    %c0_i32_0 = arith.constant 0 : i32
    %c0_i32_1 = arith.constant 0 : i32
    %c0_i32_2 = arith.constant 0 : i32
    return %c0_i32, %c0_i32_0, %c0_i32_1 : i32, i32, i32
  }
  func.func @transform_3(%arg0: i32) -> (i32, i32, i32) {
    %c0_i32 = arith.constant 0 : i32
    %c0_i32_0 = arith.constant 0 : i32
    %c0_i32_1 = arith.constant 0 : i32
    %c0_i32_2 = arith.constant 0 : i32
    return %c0_i32, %c0_i32_0, %c0_i32_1 : i32, i32, i32
  }
  func.func @transform_4(%arg0: i32) -> (i32, i32) {
    %c0_i32 = arith.constant 0 : i32
    %c0_i32_0 = arith.constant 0 : i32
    return %arg0, %c0_i32 : i32, i32
  }
}

</mosaic_0001>

<bundles_post_ra>
// kernel: autoencoder_forward.1
= control target key start
LH: loop header
LB: loop body
LE: loop exit
PB: predicated region body
PF: predicated region fallthrough
CT: control target
= control target key end

     0   :  { %v974_v0 = vmov 0.0   ;;  %vm975_vm0 = vmmov 0   ;;  %vm48_vm1 = vcmask 261120   ;;  %s1205_s1 = inlined_call_operand.vmem [shape: bf16[32,128], index: 1, kind: input, shape index: {}]   ;;  %s1206_s0 = inlined_call_operand.vmem [shape: f32[8,32], index: 0, kind: input, shape index: {}]   ;;  %s1207_s2 = inlined_call_operand.vmem [shape: bf16[5,128,128], index: 2, kind: input, shape index: {}]   ;;  %s1208_s3 = inlined_call_operand.vmem [shape: f32[6,1,128], index: 3, kind: input, shape index: {}]   ;;  %s1209_s4 = inlined_call_operand.vmem [shape: f32[8,128], index: 4, kind: output, shape index: {}]  }
   0x1   :  { %822 = vmatprep.subr.bf16.mxu0 %v974_v0  ;;  %v932_v1 = vld [vmem:[%s1205_s1] sm:$0xff]   ;;  %826 = vmatprep.mubr.msk.bf16.mxu0 %vm975_vm0, %v974_v0  ;;  %v933_v2 = vld [vmem:[%s1205_s1 + $0x8] sm:$0xff]   ;;  %v936_v7 = vld [vmem:[%s1207_s2 + $0x10] sm:$0xff]  }
   0x2   :  { %830 = vmatprep.subr.bf16.mxu1 %v974_v0  ;;  %846 = vmatprep.mubr.msk.bf16.mxu1 %vm975_vm0, %v974_v0  ;;  %v18_v3 = vld [vmem:[%s1206_s0] sm:$0xff]  ;;  %v935_v6 = vld [vmem:[%s1207_s2 + $0x8] sm:$0xff]   ;;  %v937_v8 = vld [vmem:[%s1207_s2 + $0x18] sm:$0xff]  }
   0x3   :  { %823 = vmatpush3.bf16.msra.mxu0 %v932_v1  ;;  %v934_v4 = vld [vmem:[%s1207_s2] sm:$0xff]   ;;  %v19_v5 = vpack.c.bf16 %v18_v3, %v18_v3  ;;  %v939_v10 = vld [vmem:[%s1207_s2 + $0x28] sm:$0xff]   ;;  %v940_v11 = vld [vmem:[%s1207_s2 + $0x30] sm:$0xff]  }
   0x4   :  { %824 = vmatprep.subr.bf16.mxu0 %v974_v0  ;;  %831 = vmatpush3.bf16.msra.mxu1 %v934_v4  ;;  %v938_v9 = vld [vmem:[%s1207_s2 + $0x20] sm:$0xff]   ;;  %v941_v12 = vld [vmem:[%s1207_s2 + $0x38] sm:$0xff]   ;;  %v943_v14 = vld [vmem:[%s1207_s2 + $0x48] sm:$0xff]  }
   0x5   :  { %832 = vmatprep.subr.bf16.mxu1 %v974_v0  ;;  %v942_v13 = vld [vmem:[%s1207_s2 + $0x40] sm:$0xff]   ;;  %v944_v15 = vld [vmem:[%s1207_s2 + $0x50] sm:$0xff]   ;;  %v945_v16 = vld [vmem:[%s1207_s2 + $0x58] sm:$0xff]  }
   0x6   :  { %v946_v17 = vld [vmem:[%s1207_s2 + $0x60] sm:$0xff]   ;;  %v947_v18 = vld [vmem:[%s1207_s2 + $0x68] sm:$0xff]   ;;  %v948_v27 = vld [vmem:[%s1207_s2 + $0x70] sm:$0xff]  }
   0x7   :  { %825 = vmatpush3.bf16.msra.mxu0 %v933_v2  ;;  %v661_v19 = vld [vmem:[%s1208_s3] ss:$0 sm:$0xff]  ;;  %v949_v28 = vld [vmem:[%s1207_s2 + $0x78] sm:$0xff]   ;;  %v951_v30 = vld [vmem:[%s1207_s2 + $0x88] sm:$0xff]  }
   0x8   :  { %850 = vmatprep.subr.bf16.mxu0 %v974_v0  ;;  %833 = vmatpush3.bf16.msra.mxu1 %v935_v6  ;;  %v950_v29 = vld [vmem:[%s1207_s2 + $0x80] sm:$0xff]   ;;  %v952_v31 = vld [vmem:[%s1207_s2 + $0x90] sm:$0xff]   ;;  %v953_v32 = vld [vmem:[%s1207_s2 + $0x98] sm:$0xff]  }
   0x9   :  { %834 = vmatprep.subr.bf16.mxu1 %v974_v0  ;;  %v954_v33 = vld [vmem:[%s1207_s2 + $0xa0] sm:$0xff]   ;;  %v955_v34 = vld [vmem:[%s1207_s2 + $0xa8] sm:$0xff]   ;;  %v956_v43 = vld [vmem:[%s1207_s2 + $0xb0] sm:$0xff]  }
   0xa   :  { %827 = vmatmul.mubr.msk.bf16.vlgmr.msra.gmra.mrb[0].mxu0 %vm48_vm1, %v19_v5  ;;  %v665_v35 = vld [vmem:[%s1208_s3 + $0x1] ss:$0 sm:$0xff]  ;;  %v957_v44 = vld [vmem:[%s1207_s2 + $0xb8] sm:$0xff]   ;;  %v959_v46 = vld [vmem:[%s1207_s2 + $0xc8] sm:$0xff]  }
   0xb   :  { %866 = vmatprep.mubr.msk.bf16.mxu0 %vm975_vm0, %v974_v0  ;;  %851 = vmatpush3.bf16.msra.mxu0 %v942_v13  ;;  %v958_v45 = vld [vmem:[%s1207_s2 + $0xc0] sm:$0xff]   ;;  %v960_v47 = vld [vmem:[%s1207_s2 + $0xd0] sm:$0xff]   ;;  %v961_v48 = vld [vmem:[%s1207_s2 + $0xd8] sm:$0xff]  }
   0xc   :  { %835 = vmatpush3.bf16.msra.mxu1 %v936_v7  ;;  %852 = vmatprep.subr.bf16.mxu0 %v974_v0  ;;  %v962_v49 = vld [vmem:[%s1207_s2 + $0xe0] sm:$0xff]   ;;  %v963_v50 = vld [vmem:[%s1207_s2 + $0xe8] sm:$0xff]   ;;  %v964_v59 = vld [vmem:[%s1207_s2 + $0xf0] sm:$0xff]  }
   0xd   :  { %836 = vmatprep.subr.bf16.mxu1 %v974_v0  ;;  %v690_v51 = vld [vmem:[%s1208_s3 + $0x2] ss:$0 sm:$0xff]  ;;  %v965_v60 = vld [vmem:[%s1207_s2 + $0xf8] sm:$0xff]   ;;  %v967_v62 = vld [vmem:[%s1207_s2 + $0x108] sm:$0xff]  }
   0xe   :  { %v966_v61 = vld [vmem:[%s1207_s2 + $0x100] sm:$0xff]   ;;  %v968_v63 = vld [vmem:[%s1207_s2 + $0x110] sm:$0xff]   ;;  %v969_v1 = vld [vmem:[%s1207_s2 + $0x118] sm:$0xff]  }
   0xf   :  { %853 = vmatpush3.bf16.msra.mxu0 %v943_v14  ;;  %v970_v2 = vld [vmem:[%s1207_s2 + $0x120] sm:$0xff]   ;;  %v971_v3 = vld [vmem:[%s1207_s2 + $0x128] sm:$0xff]   ;;  %v973_v13 = vld [vmem:[%s1207_s2 + $0x138] sm:$0xff]  }
  0x10   :  { %837 = vmatpush3.bf16.msra.mxu1 %v937_v8  ;;  %854 = vmatprep.subr.bf16.mxu0 %v974_v0  ;;  %v715_v4 = vld [vmem:[%s1208_s3 + $0x3] ss:$0 sm:$0xff]  ;;  %v740_v14 = vld [vmem:[%s1208_s3 + $0x4] ss:$0 sm:$0xff] }
  0x11   :  { %838 = vmatprep.subr.bf16.mxu1 %v974_v0 }
  0x13   :  { %855 = vmatpush3.bf16.msra.mxu0 %v944_v15 }
  0x14   :  { %839 = vmatpush3.bf16.msra.mxu1 %v938_v9  ;;  %856 = vmatprep.subr.bf16.mxu0 %v974_v0 }
  0x15   :  { %840 = vmatprep.subr.bf16.mxu1 %v974_v0 }
  0x17   :  { %857 = vmatpush3.bf16.msra.mxu0 %v945_v16 }
  0x18   :  { %841 = vmatpush3.bf16.msra.mxu1 %v939_v10  ;;  %858 = vmatprep.subr.bf16.mxu0 %v974_v0 }
  0x19   :  { %842 = vmatprep.subr.bf16.mxu1 %v974_v0 }
  0x1b   :  { %859 = vmatpush3.bf16.msra.mxu0 %v946_v17 }
  0x1c   :  { %843 = vmatpush3.bf16.msra.mxu1 %v940_v11  ;;  %860 = vmatprep.subr.bf16.mxu0 %v974_v0 }
  0x1d   :  { %844 = vmatprep.subr.bf16.mxu1 %v974_v0 }
  0x1f   :  { %861 = vmatpush3.bf16.msra.mxu0 %v947_v18 }
  0x20   :  { %845 = vmatpush3.bf16.msra.mxu1 %v941_v12  ;;  %862 = vmatprep.subr.bf16.mxu0 %v974_v0  ;;  %v972_v12 = vld [vmem:[%s1207_s2 + $0x130] sm:$0xff]  }
  0x21   :  { %870 = vmatprep.subr.bf16.mxu1 %v974_v0 }
  0x23   :  { %863 = vmatpush3.bf16.msra.mxu0 %v948_v27 }
  0x24   :  { %864 = vmatprep.subr.bf16.mxu0 %v974_v0 }
  0x27   :  { %865 = vmatpush3.bf16.msra.mxu0 %v949_v28 }
  0x28   :  { %890 = vmatprep.subr.bf16.mxu0 %v974_v0 }
  0xdd   :  { %v86_v20 = vpop.f32.mrb[0].mxu0 }
  0xde   :  { %v87_v21 = vadd.f32 %v661_v19, %v86_v20  ;;  %v828_v22 = vpop.f32.mrb[1].mxu0 }
  0xdf   :  { %v89_v23 = vpop.f32.mrb[2].mxu0 }
  0xe0   :  { %v92_v24 = vmax.f32 %v87_v21, 0.0  ;;  %v829_v25 = vpop.f32.mrb[3].mxu0 }
  0xe2   :  { %v93_v26 = vpack.c.bf16 %v92_v24, %v92_v24 }
  0xe4   :  { %847 = vmatmul.mubr.bf16.vlgmr.msra.gmra.mrb[0].mxu1 %v93_v26 }
  0xe5   :  { %886 = vmatprep.mubr.msk.bf16.mxu1 %vm975_vm0, %v974_v0  ;;  %871 = vmatpush3.bf16.msra.mxu1 %v950_v29 }
  0xe6   :  { %872 = vmatprep.subr.bf16.mxu1 %v974_v0 }
  0xe9   :  { %873 = vmatpush3.bf16.msra.mxu1 %v951_v30 }
  0xea   :  { %874 = vmatprep.subr.bf16.mxu1 %v974_v0 }
  0xed   :  { %875 = vmatpush3.bf16.msra.mxu1 %v952_v31 }
  0xee   :  { %876 = vmatprep.subr.bf16.mxu1 %v974_v0 }
  0xf1   :  { %877 = vmatpush3.bf16.msra.mxu1 %v953_v32 }
  0xf2   :  { %878 = vmatprep.subr.bf16.mxu1 %v974_v0 }
  0xf5   :  { %879 = vmatpush3.bf16.msra.mxu1 %v954_v33 }
  0xf6   :  { %880 = vmatprep.subr.bf16.mxu1 %v974_v0 }
  0xf9   :  { %881 = vmatpush3.bf16.msra.mxu1 %v955_v34 }
  0xfa   :  { %882 = vmatprep.subr.bf16.mxu1 %v974_v0 }
  0xfd   :  { %883 = vmatpush3.bf16.msra.mxu1 %v956_v43 }
  0xfe   :  { %884 = vmatprep.subr.bf16.mxu1 %v974_v0 }
 0x101   :  { %885 = vmatpush3.bf16.msra.mxu1 %v957_v44 }
 0x102   :  { %910 = vmatprep.subr.bf16.mxu1 %v974_v0 }
 0x1b7   :  { %v198_v36 = vpop.f32.mrb[0].mxu1 }
 0x1b8   :  { %v199_v37 = vadd.f32 %v665_v35, %v198_v36  ;;  %v848_v38 = vpop.f32.mrb[1].mxu1 }
 0x1b9   :  { %v201_v39 = vpop.f32.mrb[2].mxu1 }
 0x1ba   :  { %v204_v40 = vmax.f32 %v199_v37, 0.0  ;;  %v849_v41 = vpop.f32.mrb[3].mxu1 }
 0x1bc   :  { %v205_v42 = vpack.c.bf16 %v204_v40, %v204_v40 }
 0x1be   :  { %867 = vmatmul.mubr.bf16.vlgmr.msra.gmra.mrb[4].mxu0 %v205_v42 }
 0x1bf   :  { %906 = vmatprep.mubr.msk.bf16.mxu0 %vm975_vm0, %v974_v0  ;;  %891 = vmatpush3.bf16.msra.mxu0 %v958_v45 }
 0x1c0   :  { %892 = vmatprep.subr.bf16.mxu0 %v974_v0 }
 0x1c3   :  { %893 = vmatpush3.bf16.msra.mxu0 %v959_v46 }
 0x1c4   :  { %894 = vmatprep.subr.bf16.mxu0 %v974_v0 }
 0x1c7   :  { %895 = vmatpush3.bf16.msra.mxu0 %v960_v47 }
 0x1c8   :  { %896 = vmatprep.subr.bf16.mxu0 %v974_v0 }
 0x1cb   :  { %897 = vmatpush3.bf16.msra.mxu0 %v961_v48 }
 0x1cc   :  { %898 = vmatprep.subr.bf16.mxu0 %v974_v0 }
 0x1cf   :  { %899 = vmatpush3.bf16.msra.mxu0 %v962_v49 }
 0x1d0   :  { %900 = vmatprep.subr.bf16.mxu0 %v974_v0 }
 0x1d3   :  { %901 = vmatpush3.bf16.msra.mxu0 %v963_v50 }
 0x1d4   :  { %902 = vmatprep.subr.bf16.mxu0 %v974_v0 }
 0x1d7   :  { %903 = vmatpush3.bf16.msra.mxu0 %v964_v59 }
 0x1d8   :  { %904 = vmatprep.subr.bf16.mxu0 %v974_v0 }
 0x1db   :  { %905 = vmatpush3.bf16.msra.mxu0 %v965_v60 }
 0x291   :  { %v311_v52 = vpop.f32.mrb[4].mxu0 }
 0x292   :  { %v312_v53 = vadd.f32 %v690_v51, %v311_v52  ;;  %v868_v54 = vpop.f32.mrb[5].mxu0 }
 0x293   :  { %v314_v55 = vpop.f32.mrb[6].mxu0 }
 0x294   :  { %v317_v56 = vmax.f32 %v312_v53, 0.0  ;;  %v869_v57 = vpop.f32.mrb[7].mxu0 }
 0x296   :  { %v318_v58 = vpack.c.bf16 %v317_v56, %v317_v56 }
 0x298   :  { %887 = vmatmul.mubr.bf16.vlgmr.msra.gmra.mrb[4].mxu1 %v318_v58 }
 0x299   :  { %926 = vmatprep.mubr.msk.bf16.mxu1 %vm975_vm0, %v974_v0  ;;  %911 = vmatpush3.bf16.msra.mxu1 %v966_v61 }
 0x29a   :  { %912 = vmatprep.subr.bf16.mxu1 %v974_v0 }
 0x29d   :  { %913 = vmatpush3.bf16.msra.mxu1 %v967_v62 }
 0x29e   :  { %914 = vmatprep.subr.bf16.mxu1 %v974_v0 }
 0x2a1   :  { %915 = vmatpush3.bf16.msra.mxu1 %v968_v63 }
 0x2a2   :  { %916 = vmatprep.subr.bf16.mxu1 %v974_v0 }
 0x2a5   :  { %917 = vmatpush3.bf16.msra.mxu1 %v969_v1 }
 0x2a6   :  { %918 = vmatprep.subr.bf16.mxu1 %v974_v0 }
 0x2a9   :  { %919 = vmatpush3.bf16.msra.mxu1 %v970_v2 }
 0x2aa   :  { %920 = vmatprep.subr.bf16.mxu1 %v974_v0 }
 0x2ad   :  { %921 = vmatpush3.bf16.msra.mxu1 %v971_v3 }
 0x2ae   :  { %922 = vmatprep.subr.bf16.mxu1 %v974_v0 }
 0x2b1   :  { %923 = vmatpush3.bf16.msra.mxu1 %v972_v12 }
 0x2b2   :  { %924 = vmatprep.subr.bf16.mxu1 %v974_v0  ;;  %v765_v0 = vld [vmem:[%s1208_s3 + $0x5] ss:$0 sm:$0xff] }
 0x2b5   :  { %925 = vmatpush3.bf16.msra.mxu1 %v973_v13 }
 0x36b   :  { %v424_v5 = vpop.f32.mrb[4].mxu1 }
 0x36c   :  { %v425_v6 = vadd.f32 %v715_v4, %v424_v5  ;;  %v888_v7 = vpop.f32.mrb[5].mxu1 }
 0x36d   :  { %v427_v8 = vpop.f32.mrb[6].mxu1 }
 0x36e   :  { %v430_v9 = vmax.f32 %v425_v6, 0.0  ;;  %v889_v10 = vpop.f32.mrb[7].mxu1 }
 0x370   :  { %v431_v11 = vpack.c.bf16 %v430_v9, %v430_v9 }
 0x372   :  { %907 = vmatmul.mubr.bf16.vlgmr.msra.gmra.mrb[8].mxu0 %v431_v11 }
 0x445   :  { %v537_v15 = vpop.f32.mrb[8].mxu0 }
 0x446   :  { %v538_v16 = vadd.f32 %v740_v14, %v537_v15  ;;  %v908_v17 = vpop.f32.mrb[9].mxu0 }
 0x447   :  { %v540_v18 = vpop.f32.mrb[10].mxu0 }
 0x448   :  { %v543_v19 = vmax.f32 %v538_v16, 0.0  ;;  %v909_v20 = vpop.f32.mrb[11].mxu0 }
 0x44a   :  { %v544_v21 = vpack.c.bf16 %v543_v19, %v543_v19 }
 0x44c   :  { %927 = vmatmul.mubr.bf16.vlgmr.msra.gmra.mrb[8].mxu1 %v544_v21 }
 0x51f   :  { %v650_v22 = vpop.f32.mrb[8].mxu1 }
 0x520   :  { %v651_v23 = vadd.f32 %v765_v0, %v650_v22  ;;  %v928_v24 = vpop.f32.mrb[9].mxu1 }
 0x521   :  { %v653_v25 = vpop.f32.mrb[10].mxu1 }
 0x522   :  { %656 = vst [vmem:[%s1209_s4] sm:$0xff] %v651_v23  ;;  %v929_v26 = vpop.f32.mrb[11].mxu1 }

</bundles_post_ra>
